<compile_context>
chip_gen: v6e
topology: v6e:2x2x1
jax: 0.10.0
libtpu: 0.0.40
codegen_flags: <defaults>
</compile_context>

<pallas_src>
import functools
import math

import jax
import jax.numpy as jnp
from jax.experimental import pallas as pl
from jax.experimental.pallas import tpu as pltpu

_LANE = 128


def _round_up(x, m):
    return (x + m - 1) // m * m


def _vmem_capacity_bytes():
    """Physical VMEM per TensorCore; conservative fallback = v7x (64 MiB)."""
    try:
        cap = int(pltpu.get_tpu_info().vmem_capacity_bytes)
        if cap > 0:
            return cap
    except Exception:
        pass
    return 64 * 1024 * 1024


def _vmem_footprint(tile_m, tile_k, f_feat_pad, f_out_pad, out_bytes,
                    n_buf_a, with_w):
    """Bytes of VMEM the kernel's pipelined buffers need."""
    b = n_buf_a * tile_m * tile_k * 2          # A tiles (bf16), n_buf_a-deep
    b += 2 * tile_k * f_feat_pad * 2           # feature slab (bf16), 2 buffers
    b += tile_m * f_feat_pad * 4               # f32 accumulator scratch
    b += 2 * tile_m * f_out_pad * out_bytes    # output tile, 2 buffers
    if with_w:
        # W's index_map is constant so it is DMA'd only once, but the default
        # pipeline still reserves two (small, bf16) buffers for it.
        b += 2 * f_feat_pad * f_out_pad * 2
    return b


def _select_tiling(n_pad, f_feat_pad, f_out_pad, out_bytes, budget, with_w):
    """Return (tile_m, tile_k, A-buffer-count) sized from the VMEM footprint."""
    if n_pad % _LANE != 0:
        # Small-graph path (N < 128): a single full-array block (no 128-padding
        # of the node dims) avoids (128/N)^2 wasted FLOPs and HBM bytes.
        return n_pad, n_pad, 2
    tile_k = max(t for t in (128, 256, 512) if n_pad % t == 0)
    tm_opts = [t for t in (1024, 512, 256, 128) if n_pad % t == 0]
    multi = [t for t in tm_opts if n_pad // t >= 2]
    if multi:                       # keep >= 2 row tiles so both v7x TCs work
        tm_opts = multi
    for tile_m in tm_opts:          # prefer a larger row tile first ...
        for n_buf_a in (3, 2):      # ... then deeper A pipelining
            if _vmem_footprint(tile_m, tile_k, f_feat_pad, f_out_pad,
                               out_bytes, n_buf_a, with_w) <= budget:
                return tile_m, tile_k, n_buf_a
    return tm_opts[-1], tile_k, 2


def _apply_act(v, act):
    if act == "relu":
        return jnp.maximum(v, 0.0)
    if act == "softplus":
        return jax.nn.softplus(v)
    return v  # "linear"


def _make_a_spec(tile_m, tile_k, n_buf_a):
    if n_buf_a != 2:
        try:  # graceful fallback if this JAX build lacks pipeline_mode/Buffered
            return pl.BlockSpec((tile_m, tile_k), lambda i, k: (i, k),
                                pipeline_mode=pl.Buffered(n_buf_a))
        except (TypeError, AttributeError):
            pass
    return pl.BlockSpec((tile_m, tile_k), lambda i, k: (i, k))


# ----------------------------- kernel bodies --------------------------------
def _gcn_agg_project_kernel(a_ref, f_ref, w_ref, o_ref, acc_ref, *, act):
    """acc += A_tile @ X_tile (bf16 -> f32); epilogue: act(acc @ W), bf16 MXU."""
    k = pl.program_id(1)

    @pl.when(k == 0)
    def _():
        acc_ref[...] = jnp.zeros_like(acc_ref)

    acc_ref[...] += jnp.dot(a_ref[...], f_ref[...],
                            preferred_element_type=jnp.float32)

    @pl.when(k == pl.num_programs(1) - 1)
    def _():
        proj = jnp.dot(acc_ref[...].astype(jnp.bfloat16), w_ref[...],
                       preferred_element_type=jnp.float32)
        o_ref[...] = _apply_act(proj, act).astype(o_ref.dtype)


def _gcn_agg_kernel(a_ref, f_ref, o_ref, acc_ref, *, act):
    """Aggregation only: features are (x @ W), precomputed once by the caller."""
    k = pl.program_id(1)

    @pl.when(k == 0)
    def _():
        acc_ref[...] = jnp.zeros_like(acc_ref)

    acc_ref[...] += jnp.dot(a_ref[...], f_ref[...],
                            preferred_element_type=jnp.float32)

    @pl.when(k == pl.num_programs(1) - 1)
    def _():
        o_ref[...] = _apply_act(acc_ref[...], act).astype(o_ref.dtype)


# ------------------- glue (irregular scatter; built once) -------------------
def build_normalized_adjacency(edge_index, num_nodes, *, improved=True,
                               dtype=jnp.float32):
    """Dense GCN-normalized adjacency. Depends only on edge_index -> build once
    per timestep and reuse across every GCNConv / gate / head."""
    e = edge_index.shape[1]
    edge_weight = jnp.ones((e,), dtype=dtype)
    loop_idx = jnp.arange(num_nodes, dtype=edge_index.dtype)
    row = jnp.concatenate([edge_index[0], loop_idx])
    col = jnp.concatenate([edge_index[1], loop_idx])
    loop_w = jnp.full((num_nodes,), 2.0 if improved else 1.0, dtype=dtype)
    w_all = jnp.concatenate([edge_weight, loop_w])

    deg = jnp.zeros((num_nodes,), dtype=dtype).at[row].add(w_all)
    deg_inv = jnp.power(deg, -0.5)
    deg_inv = jnp.where(jnp.isinf(deg_inv), jnp.zeros_like(deg_inv), deg_inv)
    norm = deg_inv[row] * w_all * deg_inv[col]
    return jnp.zeros((num_nodes, num_nodes), dtype=dtype).at[row, col].add(norm)


def pad_adjacency(a_norm):
    """Pad + cast A_norm to bf16 ONCE per graph/timestep (hoisted out of the
    per-conv hot path; reused by every call that shares this adjacency)."""
    n = a_norm.shape[0]
    n_pad = _round_up(n, _LANE) if n >= _LANE else _round_up(max(n, 8), 8)
    a_p = jnp.zeros((n_pad, n_pad), jnp.bfloat16)
    return a_p.at[:n, :n].set(a_norm.astype(jnp.bfloat16))


# ------------------------------ public wrappers -----------------------------
def gcn_conv_pallas(x, weight, a_pad, *, num_nodes=None, act="relu",
                    out_dtype=None):
    """act( A_norm @ (x @ weight) ) with a pre-padded bf16 adjacency.

    x:      [N, F_in]          float
    weight: [F_in, F_out]      float
    a_pad:  [n_pad, n_pad]     bf16, from pad_adjacency(build_normalized_adjacency)
    """
    n = x.shape[0] if num_nodes is None else num_nodes
    f_in = x.shape[1]
    f_out = weight.shape[1]
    n_pad = a_pad.shape[0]
    assert a_pad.shape == (n_pad, n_pad) and n <= n_pad
    if a_pad.dtype != jnp.bfloat16:           # recommended path: pre-cast once
        a_pad = a_pad.astype(jnp.bfloat16)
    out_dtype = x.dtype if out_dtype is None else out_dtype
    out_bytes = jnp.dtype(out_dtype).itemsize

    # Run the N x N reduction against the narrower feature side.
    project_in_kernel = f_in <= f_out
    if project_in_kernel:
        feats, f_feat = x, f_in
    else:
        feats = jnp.dot(x, weight, preferred_element_type=jnp.float32)
        f_feat = f_out

    f_feat_pad = _round_up(f_feat, _LANE)
    f_out_pad = _round_up(f_out, _LANE)

    f_p = jnp.zeros((n_pad, f_feat_pad), jnp.bfloat16)
    f_p = f_p.at[:n, :f_feat].set(feats.astype(jnp.bfloat16))

    budget = (3 * _vmem_capacity_bytes()) // 4
    tile_m, tile_k, n_buf_a = _select_tiling(
        n_pad, f_feat_pad, f_out_pad, out_bytes, budget, project_in_kernel)
    grid = (n_pad // tile_m, n_pad // tile_k)
    row_tiles = grid[0]

    a_spec = _make_a_spec(tile_m, tile_k, n_buf_a)
    f_spec = pl.BlockSpec((tile_k, f_feat_pad), lambda i, k: (k, 0))
    o_spec = pl.BlockSpec((tile_m, f_out_pad), lambda i, k: (i, 0))

    footprint = _vmem_footprint(tile_m, tile_k, f_feat_pad, f_out_pad,
                                out_bytes, n_buf_a, project_in_kernel)
    compiler_params = pltpu.CompilerParams(
        dimension_semantics=("parallel", "arbitrary"),
        vmem_limit_bytes=min(footprint + (8 << 20), _vmem_capacity_bytes()),
    )

    flops = 2 * n_pad * n_pad * f_feat_pad
    bytes_accessed = (n_pad * n_pad * 2                       # A streamed once
                      + row_tiles * n_pad * f_feat_pad * 2    # feats per row tile
                      + n_pad * f_out_pad * out_bytes)        # output writeback

    if project_in_kernel:
        w_p = jnp.zeros((f_feat_pad, f_out_pad), jnp.bfloat16)
        w_p = w_p.at[:f_in, :f_out].set(weight.astype(jnp.bfloat16))
        flops += 2 * n_pad * f_feat_pad * f_out_pad
        bytes_accessed += f_feat_pad * f_out_pad * 2
        grid_spec = pltpu.PrefetchScalarGridSpec(
            num_scalar_prefetch=0, grid=grid,
            in_specs=[a_spec, f_spec,
                      pl.BlockSpec((f_feat_pad, f_out_pad), lambda i, k: (0, 0))],
            out_specs=o_spec,
            scratch_shapes=[pltpu.VMEM((tile_m, f_feat_pad), jnp.float32)])
        out_pad = pl.pallas_call(
            functools.partial(_gcn_agg_project_kernel, act=act),
            out_shape=jax.ShapeDtypeStruct((n_pad, f_out_pad), out_dtype),
            grid_spec=grid_spec,
            compiler_params=compiler_params,
            cost_estimate=pl.CostEstimate(flops=flops, transcendentals=0,
                                          bytes_accessed=bytes_accessed),
        )(a_pad, f_p, w_p)
    else:
        grid_spec = pltpu.PrefetchScalarGridSpec(
            num_scalar_prefetch=0, grid=grid,
            in_specs=[a_spec, f_spec],
            out_specs=o_spec,
            scratch_shapes=[pltpu.VMEM((tile_m, f_feat_pad), jnp.float32)])
        out_pad = pl.pallas_call(
            functools.partial(_gcn_agg_kernel, act=act),
            out_shape=jax.ShapeDtypeStruct((n_pad, f_out_pad), out_dtype),
            grid_spec=grid_spec,
            compiler_params=compiler_params,
            cost_estimate=pl.CostEstimate(flops=flops, transcendentals=0,
                                          bytes_accessed=bytes_accessed),
        )(a_pad, f_p)

    return out_pad[:n, :f_out]


def gcn_conv_fused_pallas(x, weights, a_pad, *, num_nodes=None, acts=None,
                          out_dtype=None):
    """Fuse several GCNConvs that share the same input x and adjacency A (e.g.
    the 3 GRU gate convs, or enc_mean/enc_std): one pallas_call streams A once
    against the concatenated weight, then the result is split.  Per-head
    activations are applied on the small unpadded outputs (the VGRNN GRU convs
    use identity activation, so the fusion is exact)."""
    w_cat = jnp.concatenate(list(weights), axis=1)
    fused = gcn_conv_pallas(x, w_cat, a_pad, num_nodes=num_nodes,
                            act="linear", out_dtype=out_dtype)
    offs, s = [], 0
    for w in weights[:-1]:
        s += w.shape[1]
        offs.append(s)
    outs = jnp.split(fused, offs, axis=1) if offs else [fused]
    if acts is None:
        acts = ["linear"] * len(outs)
    return [_apply_act(o, a) for o, a in zip(outs, acts)]


def glorot_init(key, in_channels, out_channels, dtype=jnp.float32):
    stdv = math.sqrt(6.0 / (in_channels + out_channels))
    return jax.random.uniform(key, (in_channels, out_channels), dtype=dtype,
                              minval=-stdv, maxval=stdv)


if __name__ == "__main__":
    key = jax.random.PRNGKey(0)
    keys = jax.random.split(key, 10)

    # ---- Case 1: small graph (N < 128) -> single full-array block path ------
    n1, f_in1, hid, e1 = 16, 8, 32, 40
    x1 = jax.random.normal(keys[0], (n1, f_in1), dtype=jnp.float32)
    w1 = glorot_init(keys[1], f_in1, hid)
    edges1 = jax.random.randint(keys[2], (2, e1), 0, n1, dtype=jnp.int32)

    a1 = build_normalized_adjacency(edges1, n1, improved=True)
    a1_pad = pad_adjacency(a1)     # built ONCE, reused by every call below

    out1 = gcn_conv_pallas(x1, w1, a1_pad, num_nodes=n1, act="relu")
    jax.block_until_ready(out1)
    ref1 = jnp.maximum(a1 @ (x1 @ w1), 0.0)
    assert out1.shape == (n1, hid)
    assert bool(jnp.all(out1 >= 0.0))
    assert bool(jnp.allclose(out1, ref1, rtol=5e-2, atol=5e-2)), float(
        jnp.max(jnp.abs(out1 - ref1)))

    # ---- Fused GRU-style gate convs (identity act) sharing the same A -------
    wz = glorot_init(keys[3], f_in1, hid)
    wr = glorot_init(keys[4], f_in1, hid)
    wh = glorot_init(keys[5], f_in1, hid)
    z_lin, r_lin, h_lin = gcn_conv_fused_pallas(x1, [wz, wr, wh], a1_pad,
                                                num_nodes=n1)
    jax.block_until_ready(h_lin)
    for got, w in ((z_lin, wz), (r_lin, wr), (h_lin, wh)):
        ref = a1 @ (x1 @ w)
        assert bool(jnp.allclose(got, ref, rtol=5e-2, atol=5e-2)), float(
            jnp.max(jnp.abs(got - ref)))

    # ---- Aggregation-only branch (F_in > F_out), reusing the same A ---------
    xb = jax.random.normal(keys[6], (n1, 48), dtype=jnp.float32)
    wb = glorot_init(keys[7], 48, 16)
    outb = gcn_conv_pallas(xb, wb, a1_pad, num_nodes=n1, act="relu")
    jax.block_until_ready(outb)
    refb = jnp.maximum(a1 @ (xb @ wb), 0.0)
    assert outb.shape == (n1, 16)
    assert bool(jnp.allclose(outb, refb, rtol=5e-2, atol=5e-2)), float(
        jnp.max(jnp.abs(outb - refb)))

    # ---- Case 2: larger graph -> tiled path (rect tiles, multi-step k) ------
    n2, f_in2, f_out2, e2 = 384, 64, 96, 1536
    x2 = jax.random.normal(keys[8], (n2, f_in2), dtype=jnp.float32)
    w2 = glorot_init(keys[9], f_in2, f_out2)
    edges2 = jax.random.randint(jax.random.PRNGKey(1), (2, e2), 0, n2,
                                dtype=jnp.int32)
    a2 = build_normalized_adjacency(edges2, n2, improved=True)
    a2_pad = pad_adjacency(a2)
    out2 = gcn_conv_pallas(x2, w2, a2_pad, num_nodes=n2, act="relu")
    jax.block_until_ready(out2)
    ref2 = jnp.maximum(a2 @ (x2 @ w2), 0.0)
    assert out2.shape == (n2, f_out2)
    assert bool(jnp.allclose(out2, ref2, rtol=5e-2, atol=5e-2)), float(
        jnp.max(jnp.abs(out2 - ref2)))

    print("KERNEL_OK")
</pallas_src>

<mosaic_0001>
module attributes {stable_mosaic.version = 11 : i64} {
  func.func @_gcn_agg_project_kernel(%arg0: i32, %arg1: i32, %arg2: memref<16x16xbf16, #tpu.memory_space<vmem>>, %arg3: memref<16x128xbf16, #tpu.memory_space<vmem>>, %arg4: memref<128x128xbf16, #tpu.memory_space<vmem>>, %arg5: memref<16x128xf32, #tpu.memory_space<vmem>>, %arg6: memref<16x128xf32, #tpu.memory_space<vmem>>) attributes {dimension_semantics = [#tpu.dimension_semantics<parallel>, #tpu.dimension_semantics<arbitrary>], iteration_bounds = array<i64: 1, 1>, scalar_prefetch = 0 : i64, scratch_operands = 1 : i64, tpu.core_type = #tpu.core_type<tc>, window_params = [{transform_indices = @transform_0, window_bounds = array<i64: 16, 16>}, {transform_indices = @transform_1, window_bounds = array<i64: 16, 128>}, {pipeline_mode = #tpu.pipeline_mode<synchronous>, transform_indices = @transform_2, window_bounds = array<i64: 128, 128>}, {transform_indices = @transform_3, window_bounds = array<i64: 16, 128>}]} {
    %c0_i32 = arith.constant 0 : i32
    %0 = arith.cmpi eq, %arg1, %c0_i32 : i32
    %1 = arith.extui %0 : i1 to i32
    %c0_i32_0 = arith.constant 0 : i32
    %2 = arith.cmpi ne, %1, %c0_i32_0 : i32
    scf.if %2 {
      %cst_10 = arith.constant 0.000000e+00 : f32
      %12 = vector.broadcast %cst_10 : f32 to vector<16x128xf32>
      %c0_11 = arith.constant 0 : index
      %c0_12 = arith.constant 0 : index
      %13 = vector.load %arg6[%c0_11, %c0_12] : memref<16x128xf32, #tpu.memory_space<vmem>>, vector<16x128xf32>
      tpu.vector_store %arg6[%c0_11, %c0_12], %12 {strides = array<i32>} : memref<16x128xf32, #tpu.memory_space<vmem>>, vector<16x128xf32>,
    } else {
    }
    %c0 = arith.constant 0 : index
    %c0_1 = arith.constant 0 : index
    %3 = vector.load %arg6[%c0, %c0_1] : memref<16x128xf32, #tpu.memory_space<vmem>>, vector<16x128xf32>
    %c0_2 = arith.constant 0 : index
    %c0_3 = arith.constant 0 : index
    %4 = vector.load %arg2[%c0_2, %c0_3] : memref<16x16xbf16, #tpu.memory_space<vmem>>, vector<16x16xbf16>
    %c0_4 = arith.constant 0 : index
    %c0_5 = arith.constant 0 : index
    %5 = vector.load %arg3[%c0_4, %c0_5] : memref<16x128xbf16, #tpu.memory_space<vmem>>, vector<16x128xbf16>
    %cst = arith.constant dense<0.000000e+00> : vector<16x128xf32>
    %6 = tpu.matmul %4, %5, %cst {dimension_numbers = #tpu.dot_dimension_numbers<[1], [0], [0], [1], [0, 0, 1, 1], [], []>} : vector<16x16xbf16>, vector<16x128xbf16>, vector<16x128xf32> -> vector<16x128xf32>
    %7 = arith.addf %3, %6 : vector<16x128xf32>
    %c0_6 = arith.constant 0 : index
    %c0_7 = arith.constant 0 : index
    %8 = vector.load %arg6[%c0_6, %c0_7] : memref<16x128xf32, #tpu.memory_space<vmem>>, vector<16x128xf32>
    tpu.vector_store %arg6[%c0_6, %c0_7], %7 {strides = array<i32>} : memref<16x128xf32, #tpu.memory_space<vmem>>, vector<16x128xf32>,
    %c0_i32_8 = arith.constant 0 : i32
    %9 = arith.cmpi eq, %arg1, %c0_i32_8 : i32
    %10 = arith.extui %9 : i1 to i32
    %c0_i32_9 = arith.constant 0 : i32
    %11 = arith.cmpi ne, %10, %c0_i32_9 : i32
    scf.if %11 {
      %c0_10 = arith.constant 0 : index
      %c0_11 = arith.constant 0 : index
      %12 = vector.load %arg6[%c0_10, %c0_11] : memref<16x128xf32, #tpu.memory_space<vmem>>, vector<16x128xf32>
      %13 = arith.truncf %12 : vector<16x128xf32> to vector<16x128xbf16>
      %c0_12 = arith.constant 0 : index
      %c0_13 = arith.constant 0 : index
      %14 = vector.load %arg4[%c0_12, %c0_13] : memref<128x128xbf16, #tpu.memory_space<vmem>>, vector<128x128xbf16>
      %cst_14 = arith.constant dense<0.000000e+00> : vector<16x128xf32>
      %15 = tpu.matmul %13, %14, %cst_14 {dimension_numbers = #tpu.dot_dimension_numbers<[1], [0], [0], [1], [0, 0, 1, 1], [], []>} : vector<16x128xbf16>, vector<128x128xbf16>, vector<16x128xf32> -> vector<16x128xf32>
      %cst_15 = arith.constant 0.000000e+00 : f32
      %16 = vector.broadcast %cst_15 : f32 to vector<16x128xf32>
      %17 = arith.maximumf %15, %16 : vector<16x128xf32>
      %c0_16 = arith.constant 0 : index
      %c0_17 = arith.constant 0 : index
      %18 = vector.load %arg5[%c0_16, %c0_17] : memref<16x128xf32, #tpu.memory_space<vmem>>, vector<16x128xf32>
      tpu.vector_store %arg5[%c0_16, %c0_17], %17 {strides = array<i32>} : memref<16x128xf32, #tpu.memory_space<vmem>>, vector<16x128xf32>,
    } else {
    }
    return
  }
  func.func @transform_0(%arg0: i32, %arg1: i32) -> (i32, i32) {
    %c0_i32 = arith.constant 0 : i32
    return %arg0, %arg1 : i32, i32
  }
  func.func @transform_1(%arg0: i32, %arg1: i32) -> (i32, i32) {
    %c0_i32 = arith.constant 0 : i32
    %c0_i32_0 = arith.constant 0 : i32
    return %arg1, %c0_i32 : i32, i32
  }
  func.func @transform_2(%arg0: i32, %arg1: i32) -> (i32, i32) {
    %c0_i32 = arith.constant 0 : i32
    %c0_i32_0 = arith.constant 0 : i32
    %c0_i32_1 = arith.constant 0 : i32
    return %c0_i32, %c0_i32_0 : i32, i32
  }
  func.func @transform_3(%arg0: i32, %arg1: i32) -> (i32, i32) {
    %c0_i32 = arith.constant 0 : i32
    %c0_i32_0 = arith.constant 0 : i32
    return %arg0, %c0_i32 : i32, i32
  }
}

</mosaic_0001>

<bundles_post_ra>
// kernel: tpu_custom_call.1
= control target key start
LH: loop header
LB: loop body
LE: loop exit
PB: predicated region body
PF: predicated region fallthrough
CT: control target
= control target key end

     0   :  { %8 = vsyncpa [#allocation4], 0  ;;  %s458_s0 = inlined_call_operand.hbm [shape: bf16[16,16], index: 0, kind: input, shape index: {}]   ;;  %s459_s1 = inlined_call_operand.hbm [shape: bf16[16,128], index: 1, kind: input, shape index: {}]   ;;  %s460_s2 = inlined_call_operand.hbm [shape: bf16[128,128], index: 2, kind: input, shape index: {}]   ;;  %s461_s3 = inlined_call_operand.hbm [shape: f32[16,128], index: 3, kind: output, shape index: {}]  }
   0x1   :  { %9 = vsyncpa [#allocation7], 0 }
   0x2   :  { %10 = vsyncpa [#allocation5], 0  ;;  %s416_s12 = smov [#allocation6]   ;;  %s417_s14 = smov [#allocation3]  }
   0x3   :  { %s28_s13 = sshll.u32 %s416_s12, 4  ;;  %s16_s15 = sshll.u32 %s417_s14, 4  ;;  %s29_s13 = int_to_ptr.vmem [resolvable:$true] %s28_s13  ;;  %s17_s15 = int_to_ptr.vmem [resolvable:$true] %s16_s15 }
   0x4   :  { %s338_s16 = scalar_lea.vmem %s29_s13, 128  ;;  %p343_p1 = scmp.lt.s32.totalorder %s29_s13, %s29_s13 }
   0x5   :  { %p339_p0 = scmp.ne.s32.totalorder %s29_s13, %s338_s16  ;;  %p344_p2 = scmp.lt.s32.totalorder %s338_s16, %s338_s16 }
   0x7   :  { %p345_p3 = por %p344_p2, %p343_p1 }
   0x9   :  { %p346_p4 = pnand %p345_p3, %p339_p0 }
   0xb   :  { %349 = shalt.err (!%p346_p4)
}
   0xc   :  { %s418_s17 = smov 64   ;;  %s419_s18 = smov 4  }
   0xd   :  { %34 = dma.hbm_to_vmem [thread:$0]  %s459_s1, 128, %s29_s13, [#allocation7], %s418_s17, %s418_s17, %s419_s18  }
   0xe   :  { %s358_s21 = scalar_lea.vmem %s17_s15, 128  ;;  %p363_p6 = scmp.lt.s32.totalorder %s17_s15, %s17_s15 }
   0xf   :  { %p359_p5 = scmp.ne.s32.totalorder %s17_s15, %s358_s21  ;;  %p364_p7 = scmp.lt.s32.totalorder %s358_s21, %s358_s21 }
  0x11   :  { %p365_p8 = por %p364_p7, %p363_p6 }
  0x13   :  { %p366_p9 = pnand %p365_p8, %p359_p5 }
  0x15   :  { %369 = shalt.err (!%p366_p9)
}
  0x16   :  { %22 = dma.hbm_to_vmem [thread:$0]  %s458_s0, 128, %s17_s15, [#allocation4], %s418_s17, %s418_s17, %s419_s18  }
  0x17   :  { %s420_s24 = smov [#allocation8]  }
  0x18   :  { %s40_s25 = sshll.u32 %s420_s24, 4  ;;  %s41_s25 = int_to_ptr.vmem [resolvable:$true] %s40_s25 }
  0x19   :  { %s378_s26 = scalar_lea.vmem %s41_s25, 1024  ;;  %p383_p11 = scmp.lt.s32.totalorder %s41_s25, %s41_s25 }
  0x1a   :  { %p379_p10 = scmp.ne.s32.totalorder %s41_s25, %s378_s26  ;;  %p384_p12 = scmp.lt.s32.totalorder %s378_s26, %s378_s26 }
  0x1c   :  { %p385_p13 = por %p384_p12, %p383_p11 }
  0x1e   :  { %p386_p0 = pnand %p385_p13, %p379_p10 }
  0x20   :  { %389 = shalt.err (!%p386_p0)
}
  0x21   :  { %46 = dma.hbm_to_vmem [thread:$0]  %s460_s2, 1024, %s41_s25, [#allocation7], %s418_s17, %s418_s17, %s419_s18  }
  0x22   :  { %410 = dma.done.wait [#allocation4], 128  }
  0x23   :  { %411 = vsyncadd [#allocation4], 4294967168 }
  0x24   :  { %412 = dma.done.wait [#allocation7], 1152  }
  0x25   :  { %413 = vsyncadd [#allocation7], 4294966144  ;;  %v421_v0 = vmov 0.0   ;;  %vm422_vm0 = vmmov 0   ;;  %v320_v1 = vld [vmem:[#allocation6] sm:$0xff]   ;;  %v321_v2 = vld [vmem:[#allocation3] sm:$0xff]  }
  0x26   :  { %284 = vmatprep.subr.bf16.mxu0 %v421_v0  ;;  %286 = vmatprep.mubr.msk.bf16.mxu0 %vm422_vm0, %v421_v0  ;;  %vm80_vm1 = vcmask 130048   ;;  %v322_v3 = vld [vmem:[#allocation8 + $0x38] sm:$0xff]   ;;  %v323_v4 = vld [vmem:[#allocation8 + $0x30] sm:$0xff]   ;;  %v324_v5 = vld [vmem:[#allocation8 + $0x28] sm:$0xff]   ;;  %s423_s0 = smov [#allocation9]  }
  0x27   :  { %290 = vmatprep.subr.bf16.mxu1 %v421_v0  ;;  %306 = vmatprep.mubr.msk.bf16.mxu1 %vm422_vm0, %v421_v0  ;;  %v325_v6 = vld [vmem:[#allocation8 + $0x20] sm:$0xff]   ;;  %v326_v7 = vld [vmem:[#allocation8 + $0x18] sm:$0xff]   ;;  %v327_v8 = vld [vmem:[#allocation8 + $0x10] sm:$0xff]   ;;  %s249_s2 = sshll.u32 %s423_s0, 4  ;;  %s250_s2 = int_to_ptr.vmem [resolvable:$true] %s249_s2 }
  0x28   :  { %285 = vmatpush3.bf16.msra.mxu0 %v320_v1  ;;  %291 = vmatpush3.bf16.msra.mxu1 %v322_v3  ;;  %v328_v9 = vld [vmem:[#allocation8 + $0x8] sm:$0xff]   ;;  %v329_v10 = vld [vmem:[#allocation8] sm:$0xff]   ;;  %s390_s28 = scalar_lea.vmem %s250_s2, 256  ;;  %p395_p2 = scmp.lt.s32.totalorder %s250_s2, %s250_s2 }
  0x29   :  { %292 = vmatprep.subr.bf16.mxu1 %v421_v0  ;;  %p391_p1 = scmp.ne.s32.totalorder %s250_s2, %s390_s28  ;;  %p396_p3 = scmp.lt.s32.totalorder %s390_s28, %s390_s28 }
  0x2b   :  { %287 = vmatmul.mubr.msk.bf16.vlgmr.msra.gmra.mxu0 %vm80_vm1, %v321_v2  ;;  %p397_p4 = por %p396_p3, %p395_p2 }
  0x2c   :  { %293 = vmatpush3.bf16.msra.mxu1 %v323_v4 }
  0x2d   :  { %294 = vmatprep.subr.bf16.mxu1 %v421_v0  ;;  %p398_p5 = pnand %p397_p4, %p391_p1 }
  0x30   :  { %295 = vmatpush3.bf16.msra.mxu1 %v324_v5 }
  0x31   :  { %296 = vmatprep.subr.bf16.mxu1 %v421_v0 }
  0x34   :  { %297 = vmatpush3.bf16.msra.mxu1 %v325_v6 }
  0x35   :  { %298 = vmatprep.subr.bf16.mxu1 %v421_v0 }
  0x38   :  { %299 = vmatpush3.bf16.msra.mxu1 %v326_v7 }
  0x39   :  { %300 = vmatprep.subr.bf16.mxu1 %v421_v0 }
  0x3c   :  { %301 = vmatpush3.bf16.msra.mxu1 %v327_v8 }
  0x3d   :  { %302 = vmatprep.subr.bf16.mxu1 %v421_v0 }
  0x40   :  { %303 = vmatpush3.bf16.msra.mxu1 %v328_v9 }
  0x41   :  { %304 = vmatprep.subr.bf16.mxu1 %v421_v0 }
  0x44   :  { %305 = vmatpush3.bf16.msra.mxu1 %v329_v10 }
  0xeb   :  { %v118_v11 = vpop.f32.mrf.mxu0 }
  0xed   :  { %v288_v12 = vpop.f32.mrf.mxu0 }
  0xef   :  { %v121_v13 = vpop.f32.mrf.mxu0 }
  0xf0   :  { %v134_v14 = vpack.c.bf16 %v121_v13, %v118_v11 }
  0xf1   :  { %v289_v15 = vpop.f32.mrf.mxu0 }
  0xf2   :  { %307 = vmatmul.mubr.bf16.vlgmr.msra.gmra.mxu1 %v134_v14 }
 0x1b2   :  { %v233_v16 = vpop.f32.mrf.mxu1 }
 0x1b3   :  { %v240_v17 = vmax.f32 %v233_v16, 0.0 }
 0x1b4   :  { %v308_v18 = vpop.f32.mrf.mxu1 }
 0x1b5   :  { %242 = vst [vmem:[#allocation9] sm:$0xff] %v240_v17 }
 0x1b6   :  { %v236_v19 = vpop.f32.mrf.mxu1 }
 0x1b7   :  { %v241_v20 = vmax.f32 %v236_v19, 0.0 }
 0x1b8   :  { %v309_v21 = vpop.f32.mrf.mxu1 }
 0x1b9   :  { %243 = vst [vmem:[#allocation9 + $0x8] sm:$0xff] %v241_v20 }
 0x1ba   :  { %401 = shalt.err (!%p398_p5)
}
 0x1bb   :  { %s424_s29 = smov 128   ;;  %s425_s30 = smov 8  }
 0x1bc   :  { %255 = dma.vmem_to_hbm [thread:$0]  %s250_s2, 256, %s461_s3, [#allocation5], %s424_s29, %s424_s29, %s425_s30  }
 0x1bd   :  { %414 = dma.done.wait [#allocation5], 256  }
 0x1be   :  { %415 = vsyncadd [#allocation5], 4294967040 }
 0x1bf   :  { %259 = vsyncpa [#allocation4], 1 }
 0x1c0   :  { %260 = vsyncpa [#allocation7], 1 }
 0x1c1   :  { %261 = vsyncpa [#allocation5], 1 }

</bundles_post_ra>
